<compile_context>
chip_gen: v7x
topology: tpu7x:2x2x1
jax: 0.10.0
libtpu: 0.0.40
codegen_flags: <defaults>
</compile_context>

<pallas_src>
import jax
import jax.numpy as jnp
from jax.experimental import pallas as pl
from jax.experimental.pallas import tpu as pltpu

_MIN_PALLAS_BYTES = 2 * 1024 * 1024     # below this, fused XLA multiply wins
_TARGET_BLOCK_BYTES = 6 * 1024 * 1024   # big blocks: per-step overhead < ~10% on v7x
_FLOOR_BLOCK_BYTES = 512 * 1024         # don't shrink blocks below ~512 KiB
_MIN_GRID_STEPS = 4                     # keep the pipeline (and v7x TC split) busy
_LANE_CANDIDATES = (2048, 1024, 512, 256, 128)
_VMEM_LIMIT_BYTES = 32 * 1024 * 1024    # safe on v5e/v6e/v7x; we need <= ~24 MiB


def _scale_kernel(s_ref, x_ref, o_ref):
    # s_ref: (1,) f32 scalar parameter in SMEM (scalar prefetch)
    # x_ref / o_ref: (block_rows, lanes) VMEM tiles
    o_ref[...] = (s_ref[0] * x_ref[...]).astype(o_ref.dtype)


def _sublane_tile(itemsize):
    # Packed sublane tile: 8 rows for 4-byte, 16 for 2-byte, 32 for 1-byte dtypes.
    return max(8, 32 // itemsize)


def _round_up(v, m):
    return ((v + m - 1) // m) * m


def _choose_layout(n, itemsize):
    """Pick (lanes, rows, block_rows) for a lane-dense slab, or None if n is
    not divisible by any candidate lane width (then we fall back to XLA)."""
    sub = _sublane_tile(itemsize)
    best = None
    for lanes in _LANE_CANDIDATES:
        if n % lanes != 0:
            continue
        rows = n // lanes
        if best is None:
            best = (lanes, rows)          # widest divisible lanes as fallback
        if rows >= sub * _MIN_GRID_STEPS:
            best = (lanes, rows)          # widest lanes that still allow >= MIN steps
            break
    if best is None:
        return None

    lanes, rows = best
    row_bytes = lanes * itemsize
    target_rows = max(sub, (_TARGET_BLOCK_BYTES // row_bytes) // sub * sub)
    floor_rows = max(sub, (_FLOOR_BLOCK_BYTES // row_bytes) // sub * sub)
    # Shrink the block so the grid has at least _MIN_GRID_STEPS steps (when the
    # tensor is big enough), restoring double-buffering and the megacore split.
    steps_rows = _round_up(pl.cdiv(rows, _MIN_GRID_STEPS), sub)
    block_rows = min(target_rows, steps_rows)
    block_rows = max(block_rows, floor_rows)
    block_rows = min(block_rows, _round_up(rows, sub))
    return lanes, rows, block_rows


def opt_scale(x, scaling_factor):
    """Pallas implementation of OptScale.forward: scaling_factor * x."""
    # SMEM is 32-bit scalar memory -> always carry the parameter as f32.
    sf = jnp.asarray(scaling_factor, jnp.float32).reshape((1,))
    n = x.size

    layout = None
    if n * x.dtype.itemsize >= _MIN_PALLAS_BYTES:
        layout = _choose_layout(n, x.dtype.itemsize)

    if layout is None:
        # Small-input fast path / irregular-size fallback: single fused XLA op.
        # TODO(synk): output dtype pinned to x.dtype; differs from torch
        # promotion only when param/input dtypes differ (kernel path matches).
        return (sf * x).astype(x.dtype)

    lanes, rows, block_rows = layout
    x2d = x.reshape(rows, lanes)          # free metadata reshape for contiguous x
    grid = (pl.cdiv(rows, block_rows),)   # partial last block handled by Pallas

    out2d = pl.pallas_call(
        _scale_kernel,
        out_shape=jax.ShapeDtypeStruct((rows, lanes), x.dtype),
        grid_spec=pltpu.PrefetchScalarGridSpec(
            num_scalar_prefetch=1,        # sf -> SMEM once, before the grid runs
            grid=grid,
            in_specs=[
                pl.BlockSpec((block_rows, lanes), lambda i, sf_ref: (i, 0)),
            ],
            out_specs=pl.BlockSpec((block_rows, lanes), lambda i, sf_ref: (i, 0)),
        ),
        compiler_params=pltpu.CompilerParams(
            dimension_semantics=("parallel",),      # shards grid across v7x's 2 TCs
            vmem_limit_bytes=_VMEM_LIMIT_BYTES,     # explicit: v5e default is 16 MiB
        ),
    )(sf, x2d)

    return out2d.reshape(x.shape)


if __name__ == "__main__":
    key = jax.random.PRNGKey(0)

    # Small NCHW input, matching the module's typical usage.
    x = jax.random.normal(key, (2, 4, 16, 16), dtype=jnp.float32)

    # Parameter init matches torch.zeros(1) in OptScale.__init__
    scaling_factor = jnp.zeros((1,), dtype=jnp.float32)

    out = jax.block_until_ready(opt_scale(x, scaling_factor))
    assert out.shape == x.shape and out.dtype == x.dtype
    assert jnp.allclose(out, scaling_factor * x), "mismatch vs reference (zero scale)"

    # Nonzero scale to exercise the multiply path (small -> XLA fast path).
    sf2 = jnp.array([1.7], dtype=jnp.float32)
    out2 = jax.block_until_ready(opt_scale(x, sf2))
    assert jnp.allclose(out2, sf2 * x, atol=1e-6), "mismatch vs reference (nonzero scale)"

    # 4 MiB f32 input -> Pallas path, grid of >= 4 full blocks.
    xb = jax.random.normal(jax.random.PRNGKey(1), (4, 64, 64, 64), dtype=jnp.float32)
    outb = jax.block_until_ready(opt_scale(xb, sf2))
    assert jnp.allclose(outb, sf2 * xb, atol=1e-6), "mismatch vs reference (pallas path)"

    # Input whose row count is NOT a multiple of block_rows -> masked partial block.
    xc = jax.random.normal(jax.random.PRNGKey(2), (3, 25, 64, 128), dtype=jnp.float32)
    outc = jax.block_until_ready(opt_scale(xc, sf2))
    assert jnp.allclose(outc, sf2 * xc, atol=1e-6), "mismatch vs reference (partial block)"

    # bf16 input -> exercises the 16-row packed sublane tile rounding.
    xd = jax.random.normal(jax.random.PRNGKey(3), (4, 64, 64, 64)).astype(jnp.bfloat16)
    outd = jax.block_until_ready(opt_scale(xd, sf2))
    refd = (sf2 * xd).astype(jnp.bfloat16)
    assert outd.dtype == jnp.bfloat16
    assert jnp.allclose(outd.astype(jnp.float32), refd.astype(jnp.float32),
                        atol=1e-2), "mismatch vs reference (bf16 path)"

    print("KERNEL_OK")
</pallas_src>

<mosaic_0001>
module attributes {stable_mosaic.version = 11 : i64} {
  func.func @_scale_kernel(%arg0: i32, %arg1: memref<1xf32, #tpu.memory_space<smem>>, %arg2: memref<128x2048xf32, #tpu.memory_space<vmem>>, %arg3: memref<128x2048xf32, #tpu.memory_space<vmem>>) attributes {dimension_semantics = [#tpu.dimension_semantics<parallel>], iteration_bounds = array<i64: 4>, scalar_prefetch = 1 : i64, scratch_operands = 0 : i64, tpu.core_type = #tpu.core_type<tc>, window_params = [{transform_indices = @transform_0, window_bounds = array<i64: 128, 2048>}, {transform_indices = @transform_1, window_bounds = array<i64: 128, 2048>}]} {
    %c0 = arith.constant 0 : index
    %0 = memref.load %arg1[%c0] : memref<1xf32, #tpu.memory_space<smem>>
    %c0_0 = arith.constant 0 : index
    %c0_1 = arith.constant 0 : index
    %1 = vector.load %arg2[%c0_0, %c0_1] : memref<128x2048xf32, #tpu.memory_space<vmem>>, vector<128x2048xf32>
    %2 = vector.broadcast %0 : f32 to vector<128x2048xf32>
    %3 = arith.mulf %2, %1 : vector<128x2048xf32>
    %c0_2 = arith.constant 0 : index
    %c0_3 = arith.constant 0 : index
    %4 = vector.load %arg3[%c0_2, %c0_3] : memref<128x2048xf32, #tpu.memory_space<vmem>>, vector<128x2048xf32>
    tpu.vector_store %arg3[%c0_2, %c0_3], %3 {strides = array<i32>} : memref<128x2048xf32, #tpu.memory_space<vmem>>, vector<128x2048xf32>,
    return
  }
  func.func @transform_0(%arg0: i32, %arg1: memref<1xf32, #tpu.memory_space<smem>>) -> (i32, i32) {
    %c0_i32 = arith.constant 0 : i32
    %c0_i32_0 = arith.constant 0 : i32
    return %arg0, %c0_i32 : i32, i32
  }
  func.func @transform_1(%arg0: i32, %arg1: memref<1xf32, #tpu.memory_space<smem>>) -> (i32, i32) {
    %c0_i32 = arith.constant 0 : i32
    %c0_i32_0 = arith.constant 0 : i32
    return %arg0, %c0_i32 : i32, i32
  }
}

</mosaic_0001>

<bundles_post_ra>
// kernel: tpu_custom_call.1
= control target key start
LH: loop header
LB: loop body
LE: loop exit
PB: predicated region body
PF: predicated region fallthrough
CT: control target
= control target key end

     0   :  { %s2125_s0 = inlined_call_operand.<no memory space> [shape: f32[1], index: 0, kind: input, shape index: {}]   ;;  %s2126_s1 = inlined_call_operand.hbm [shape: f32[512,2048], index: 1, kind: input, shape index: {}]   ;;  %s2127_s2 = inlined_call_operand.hbm [shape: f32[512,2048], index: 2, kind: output, shape index: {}]  }
   0x1   :  { %7 = sst [smem:[#allocation3]] %s2125_s0 }
   0x2   :  { %8 = vsyncpa [#allocation5], 0 }
   0x3   :  { %10 = vsyncpa [#allocation5 + $0x1], 0 }
   0x4   :  { %11 = vsyncpa [#allocation6], 0 }
   0x5   :  { %13 = vsyncpa [#allocation6 + $0x1], 0  ;;  %s1190_s11 = smov 0   ;;  %s1192_s12 = smov 0  }
   0x6   :  { %s1194_s13 = smov 0   ;;  %s1196_s14 = smov 0  }
   0x7 LB: > { %s1211_s0 = sadd.s32 4294967295, %s1164_s14   ;;  %s998_s15 = sadd.s32 4294967294, %s1164_s14   ;;  %s1164_s14 = sphi %s1196_s14, %s2139_s14   ;;  %s1160_s13 = sphi %s1194_s13, %s2138_s13   ;;  %s1156_s12 = sphi %s1192_s12, %s2137_s12   ;;  %s1152_s11 = sphi %s1190_s11, %s2136_s11  }
   0x8   : > { %s1215_s16 = sadd.s32 1, %s1164_s14   ;;  %s26_s17 = sadd.s32 1, %s1160_s13 }
   0x9   : > { %s23_s18 = ssub.s32 %s1164_s14, %s1215_s16  ;;  %p33_p0 = scmp.ne.s32.totalorder %s1160_s13, %s1156_s12 }
   0xa   : > { %p24_p1 = scmp.eq.s32.totalorder %s23_s18, 0  ;;  %p34_p2 = scmp.eq.s32.totalorder %s1164_s14, 0 }
   0xb   : > { %p39_p3 = scmp.ne.s32.totalorder %s1156_s12, %s1152_s11  ;;  %p40_p4 = scmp.eq.s32.totalorder %s1211_s0, 0 }
   0xc   : > { %s1227_s19 = scalar_select %p24_p1, %s1160_s13, %s26_s17  }
   0xd   : > { %p1229_p5 = por %p34_p2, %p33_p0  ;;  %p1233_p6 = por %p40_p4, %p39_p3 }
   0xe   : > { %p63_p7 = scmp.eq.s32.totalorder %s1211_s0, 3  ;;  %p69_p8 = scmp.eq.s32.totalorder %s998_s15, 3 }
   0xf   : > { %p1030_p9 = scmp.lt.s32.totalorder %s1164_s14, 4  ;;  %s89_s24 = sand.u32 1, %s1160_s13  }
  0x10   : > { %p1239_p10 = por %p63_p7, %p33_p0  ;;  %p1243_p11 = por %p69_p8, %p39_p3 }
  0x11   : > { %s1015_s25 = sshll.u32 %s1164_s14, 15  ;;  %s1001_s26 = sshll.u32 %s89_s24, 11 }
  0x12   : > { %s2131_s22 = scalar_select %p1239_p10, 1, 0 }
  0x13   : > { %s2132_s23 = scalar_select %p1243_p11, 1, 0 }
  0x14   : > { %s1252_s29 = scalar_lea.hbm %s2126_s1, %s1015_s25  ;;  %s93_s30 = scalar_lea.vmem [#allocation4], %s1001_s26 }
  0x15   : > { %s101_s3 = sshll.u32 %s93_s30, 4  ;;  %p1256_p12 = pnand %p1030_p9, %p1229_p5  ;;  %s1260_s3 = int_to_ptr.vmem [resolvable:$true] %s101_s3 }
  0x16   : > { %s1262_s5 = scalar_lea.sflag [#allocation5], %s89_s24  ;;  %s1068_s6 = scalar_lea.hbm %s1252_s29, 32768 }
  0x17   : > { %p1069_p13 = scmp.ne.s32.totalorder %s1252_s29, %s1068_s6  ;;  %p1070_p0 = pneg %p1256_p12 }
  0x18   : > { %s1073_s9 = scalar_lea.hbm %s2126_s1, 131072  ;;  %p1074_p3 = scmp.lt.u32.totalorder %s1252_s29, %s2126_s1 }
  0x19   : > { %p1071_p1 = pnand %p1070_p0, %p1069_p13  ;;  %p1075_p4 = scmp.lt.u32.totalorder %s1073_s9, %s1068_s6 }
  0x1a   : > { %p1077_p7 = scmp.lt.u32.totalorder %s1068_s6, %s1252_s29 }
  0x1b   : > { %p1072_p2 = pneg %p1071_p1  ;;  %p1076_p5 = por %p1075_p4, %p1074_p3 }
  0x1d   : > { %p1078_p8 = por %p1077_p7, %p1076_p5 }
  0x1f   : > { %p1079_p9 = pnand %p1078_p8, %p1072_p2 }
  0x21   : > { %1082 = shalt.err (!%p1079_p9)
}
  0x22   : > { %s1083_s17 = scalar_lea.vmem %s1260_s3, 32768  ;;  %s1166_s18 = smov [#allocation4]  }
  0x23   : > { %p1084_p13 = scmp.ne.s32.totalorder %s1260_s3, %s1083_s17  ;;  %s1088_s20 = sshll.u32 %s1166_s18, 4  ;;  %s1089_s20 = int_to_ptr.vmem [resolvable:$false] %s1088_s20 }
  0x24   : > { %s1090_s24 = scalar_lea.vmem %s1089_s20, 65536  ;;  %p1091_p10 = scmp.lt.s32.totalorder %s1260_s3, %s1089_s20 }
  0x25   : > { %p1086_p1 = pnand %p1084_p13, %p1070_p0  ;;  %p1092_p3 = scmp.lt.s32.totalorder %s1090_s24, %s1083_s17 }
  0x27   : > { %p1087_p11 = pneg %p1086_p1  ;;  %p1093_p4 = por %p1092_p3, %p1091_p10 }
  0x29   : > { %p1094_p5 = pnand %p1093_p4, %p1087_p11 }
  0x2b   : > { %1097 = shalt.err (!%p1094_p5)
}
  0x2c   : > { %s1167_s25 = smov 2048   ;;  %s1168_s26 = smov 128  }
  0x2d   : > { %1025 = dma.hbm_to_vmem [thread:$0]  (!%p1256_p12), %s1252_s29, 32768, %s1260_s3, %s1262_s5, %s1167_s25, %s1167_s25, %s1168_s26  }
  0x2e   : > { %p1005_p0 = scmp.ge.s32.totalorder %s1164_s14, 1  ;;  %p109_p2 = scmp.lt.s32.totalorder %s1164_s14, 5 }
  0x30   : > { %p110_p7 = pnand %p1005_p0, %p109_p2 }
  0x31   : > { %s1293_s27 = sand.u32 (!%p110_p7), 1, %s1156_s12  }
  0x32   : > { %113 = sbr.rel (%p110_p7) target bundleno = 209 (0xd1), region = 24  ;;  %s1006_s28 = sshll.u32 (!%p110_p7), %s1293_s27, 11 }
  0x33   : > { %s116_s30 = scalar_lea.sflag (!%p110_p7), [#allocation5], %s1293_s27  ;;  %s1297_s6 = scalar_lea.vmem (!%p110_p7), [#allocation4], %s1006_s28 }
  0x39   : > { %1143 = dma.done.wait (%p1233_p6), %s116_s30, 32768  }
  0x3a   : > { %1145 = vsyncadd (%p1233_p6), %s116_s30, 4294934528  ;;  %s140_s29 = sld [smem:[#allocation3]]  ;;  %v141_v0 = vld [vmem:[%s1297_s6] sm:$0xff]  ;;  %v142_v2 = vld [vmem:[%s1297_s6 + $0x8] sm:$0xff]  ;;  %s1320_s21 = scalar_lea.vmem [#allocation7], %s1006_s28 }
  0x3b   : > { %v143_v3 = vld [vmem:[%s1297_s6 + $0x10] sm:$0xff]  ;;  %v144_v7 = vld [vmem:[%s1297_s6 + $0x18] sm:$0xff]  ;;  %v145_v8 = vld [vmem:[%s1297_s6 + $0x20] sm:$0xff]  ;;  %s1017_s3 = sshll.u32 %s1211_s0, 15  ;;  %s925_s4 = sshll.u32 %s1320_s21, 4  ;;  %s2074_s4 = int_to_ptr.vmem [resolvable:$true] %s925_s4 }
  0x3c   : > { %v146_v9 = vld [vmem:[%s1297_s6 + $0x28] sm:$0xff]  ;;  %v147_v13 = vld [vmem:[%s1297_s6 + $0x30] sm:$0xff]  ;;  %v148_v14 = vld [vmem:[%s1297_s6 + $0x38] sm:$0xff]  ;;  %s2072_s7 = scalar_lea.hbm %s2127_s2, %s1017_s3  ;;  %s911_s8 = scalar_lea.sflag [#allocation6], %s1293_s27 }
  0x3d   : > { %v149_v15 = vld [vmem:[%s1297_s6 + $0x40] sm:$0xff]  ;;  %v150_v19 = vld [vmem:[%s1297_s6 + $0x48] sm:$0xff]  ;;  %v151_v20 = vld [vmem:[%s1297_s6 + $0x50] sm:$0xff]  ;;  %s1098_s9 = scalar_lea.vmem %s2074_s4, 32768  ;;  %p2134_p10 = scmp.ne.s32.totalorder %s2131_s22, 0 }
  0x3e   : > { %v152_v21 = vld [vmem:[%s1297_s6 + $0x58] sm:$0xff]  ;;  %v153_v25 = vld [vmem:[%s1297_s6 + $0x60] sm:$0xff]  ;;  %v154_v26 = vld [vmem:[%s1297_s6 + $0x68] sm:$0xff]  ;;  %p1099_p6 = scmp.ne.s32.totalorder %s2074_s4, %s1098_s9  ;;  %s1169_s10 = smov [#allocation7]  }
  0x3f   : > { %v155_v27 = vld [vmem:[%s1297_s6 + $0x70] sm:$0xff]  ;;  %v156_v31 = vld [vmem:[%s1297_s6 + $0x78] sm:$0xff]  ;;  %v157_v32 = vld [vmem:[%s1297_s6 + $0x80] sm:$0xff]  ;;  %s1102_s15 = sshll.u32 %s1169_s10, 4  ;;  %s1103_s15 = int_to_ptr.vmem [resolvable:$false] %s1102_s15 }
  0x40   : > { %v1304_v1 = vstv %s140_s29  ;;  %v158_v33 = vld [vmem:[%s1297_s6 + $0x88] sm:$0xff]  ;;  %v159_v37 = vld [vmem:[%s1297_s6 + $0x90] sm:$0xff]  ;;  %v160_v38 = vld [vmem:[%s1297_s6 + $0x98] sm:$0xff]  ;;  %p1100_p11 = pnand %p1099_p6, %p2134_p10  ;;  %s1104_s17 = scalar_lea.vmem %s1103_s15, 65536 }
  0x41   : > { %v398_v4 = vmul.f32 %v1304_v1, %v141_v0  ;;  %v399_v5 = vmul.f32 %v1304_v1, %v142_v2  ;;  %v400_v6 = vmul.f32 %v1304_v1, %v143_v3  ;;  %v401_v10 = vmul.f32 %v1304_v1, %v144_v7  ;;  %v161_v39 = vld [vmem:[%s1297_s6 + $0xa0] sm:$0xff]  ;;  %v162_v43 = vld [vmem:[%s1297_s6 + $0xa8] sm:$0xff]  ;;  %v163_v44 = vld [vmem:[%s1297_s6 + $0xb0] sm:$0xff]  ;;  %p1105_p8 = scmp.lt.s32.totalorder %s2074_s4, %s1103_s15  ;;  %p1106_p9 = scmp.lt.s32.totalorder %s1104_s17, %s1098_s9 }
  0x42   : > { %v402_v11 = vmul.f32 %v1304_v1, %v145_v8  ;;  %v403_v12 = vmul.f32 %v1304_v1, %v146_v9  ;;  %v404_v16 = vmul.f32 %v1304_v1, %v147_v13  ;;  %v405_v17 = vmul.f32 %v1304_v1, %v148_v14  ;;  %v164_v45 = vld [vmem:[%s1297_s6 + $0xb8] sm:$0xff]  ;;  %v165_v49 = vld [vmem:[%s1297_s6 + $0xc0] sm:$0xff]  ;;  %v166_v50 = vld [vmem:[%s1297_s6 + $0xc8] sm:$0xff]  ;;  %p1101_p12 = pneg %p1100_p11 }
  0x43   : > { %654 = vst [vmem:[%s1320_s21] sm:$0xff] %v398_v4  ;;  %655 = vst [vmem:[%s1320_s21 + $0x8] sm:$0xff] %v399_v5  ;;  %v406_v18 = vmul.f32 %v1304_v1, %v149_v15  ;;  %v407_v22 = vmul.f32 %v1304_v1, %v150_v19  ;;  %v408_v23 = vmul.f32 %v1304_v1, %v151_v20  ;;  %v167_v51 = vld [vmem:[%s1297_s6 + $0xd0] sm:$0xff]  ;;  %v168_v55 = vld [vmem:[%s1297_s6 + $0xd8] sm:$0xff]  ;;  %p1107_p13 = por %p1106_p9, %p1105_p8 }
  0x44   : > { %656 = vst [vmem:[%s1320_s21 + $0x10] sm:$0xff] %v400_v6  ;;  %657 = vst [vmem:[%s1320_s21 + $0x18] sm:$0xff] %v401_v10  ;;  %v409_v24 = vmul.f32 %v1304_v1, %v152_v21  ;;  %v410_v28 = vmul.f32 %v1304_v1, %v153_v25  ;;  %v411_v29 = vmul.f32 %v1304_v1, %v154_v26  ;;  %v169_v56 = vld [vmem:[%s1297_s6 + $0xe0] sm:$0xff]  ;;  %v170_v57 = vld [vmem:[%s1297_s6 + $0xe8] sm:$0xff] }
  0x45   : > { %658 = vst [vmem:[%s1320_s21 + $0x20] sm:$0xff] %v402_v11  ;;  %659 = vst [vmem:[%s1320_s21 + $0x28] sm:$0xff] %v403_v12  ;;  %v412_v30 = vmul.f32 %v1304_v1, %v155_v27  ;;  %v413_v34 = vmul.f32 %v1304_v1, %v156_v31  ;;  %v414_v35 = vmul.f32 %v1304_v1, %v157_v32  ;;  %v171_v61 = vld [vmem:[%s1297_s6 + $0xf0] sm:$0xff]  ;;  %v172_v62 = vld [vmem:[%s1297_s6 + $0xf8] sm:$0xff]  ;;  %p1108_p1 = pnand %p1107_p13, %p1101_p12 }
  0x46   : > { %660 = vst [vmem:[%s1320_s21 + $0x30] sm:$0xff] %v404_v16  ;;  %661 = vst [vmem:[%s1320_s21 + $0x38] sm:$0xff] %v405_v17  ;;  %v415_v36 = vmul.f32 %v1304_v1, %v158_v33  ;;  %v416_v40 = vmul.f32 %v1304_v1, %v159_v37  ;;  %v417_v41 = vmul.f32 %v1304_v1, %v160_v38  ;;  %v173_v63 = vld [vmem:[%s1297_s6 + $0x100] sm:$0xff]  ;;  %v174_v4 = vld [vmem:[%s1297_s6 + $0x108] sm:$0xff] }
  0x47   : > { %662 = vst [vmem:[%s1320_s21 + $0x40] sm:$0xff] %v406_v18  ;;  %663 = vst [vmem:[%s1320_s21 + $0x48] sm:$0xff] %v407_v22  ;;  %v418_v42 = vmul.f32 %v1304_v1, %v161_v39  ;;  %v419_v46 = vmul.f32 %v1304_v1, %v162_v43  ;;  %v420_v47 = vmul.f32 %v1304_v1, %v163_v44  ;;  %v175_v5 = vld [vmem:[%s1297_s6 + $0x110] sm:$0xff]  ;;  %v176_v6 = vld [vmem:[%s1297_s6 + $0x118] sm:$0xff] }
  0x48   : > { %664 = vst [vmem:[%s1320_s21 + $0x50] sm:$0xff] %v408_v23  ;;  %665 = vst [vmem:[%s1320_s21 + $0x58] sm:$0xff] %v409_v24  ;;  %v421_v48 = vmul.f32 %v1304_v1, %v164_v45  ;;  %v422_v52 = vmul.f32 %v1304_v1, %v165_v49  ;;  %v423_v53 = vmul.f32 %v1304_v1, %v166_v50  ;;  %v177_v10 = vld [vmem:[%s1297_s6 + $0x120] sm:$0xff]  ;;  %v178_v11 = vld [vmem:[%s1297_s6 + $0x128] sm:$0xff] }
  0x49   : > { %666 = vst [vmem:[%s1320_s21 + $0x60] sm:$0xff] %v410_v28  ;;  %667 = vst [vmem:[%s1320_s21 + $0x68] sm:$0xff] %v411_v29  ;;  %v424_v54 = vmul.f32 %v1304_v1, %v167_v51  ;;  %v425_v58 = vmul.f32 %v1304_v1, %v168_v55  ;;  %v426_v59 = vmul.f32 %v1304_v1, %v169_v56  ;;  %v179_v12 = vld [vmem:[%s1297_s6 + $0x130] sm:$0xff]  ;;  %v180_v16 = vld [vmem:[%s1297_s6 + $0x138] sm:$0xff] }
  0x4a   : > { %668 = vst [vmem:[%s1320_s21 + $0x70] sm:$0xff] %v412_v30  ;;  %669 = vst [vmem:[%s1320_s21 + $0x78] sm:$0xff] %v413_v34  ;;  %v427_v60 = vmul.f32 %v1304_v1, %v170_v57  ;;  %v428_v0 = vmul.f32 %v1304_v1, %v171_v61  ;;  %v429_v2 = vmul.f32 %v1304_v1, %v172_v62  ;;  %v181_v17 = vld [vmem:[%s1297_s6 + $0x140] sm:$0xff]  ;;  %v182_v18 = vld [vmem:[%s1297_s6 + $0x148] sm:$0xff] }
  0x4b   : > { %670 = vst [vmem:[%s1320_s21 + $0x80] sm:$0xff] %v414_v35  ;;  %671 = vst [vmem:[%s1320_s21 + $0x88] sm:$0xff] %v415_v36  ;;  %v430_v3 = vmul.f32 %v1304_v1, %v173_v63  ;;  %v431_v7 = vmul.f32 %v1304_v1, %v174_v4  ;;  %v432_v8 = vmul.f32 %v1304_v1, %v175_v5  ;;  %v183_v22 = vld [vmem:[%s1297_s6 + $0x150] sm:$0xff]  ;;  %v184_v23 = vld [vmem:[%s1297_s6 + $0x158] sm:$0xff] }
  0x4c   : > { %672 = vst [vmem:[%s1320_s21 + $0x90] sm:$0xff] %v416_v40  ;;  %673 = vst [vmem:[%s1320_s21 + $0x98] sm:$0xff] %v417_v41  ;;  %v433_v9 = vmul.f32 %v1304_v1, %v176_v6  ;;  %v434_v13 = vmul.f32 %v1304_v1, %v177_v10  ;;  %v435_v14 = vmul.f32 %v1304_v1, %v178_v11  ;;  %v185_v24 = vld [vmem:[%s1297_s6 + $0x160] sm:$0xff]  ;;  %v186_v28 = vld [vmem:[%s1297_s6 + $0x168] sm:$0xff] }
  0x4d   : > { %674 = vst [vmem:[%s1320_s21 + $0xa0] sm:$0xff] %v418_v42  ;;  %675 = vst [vmem:[%s1320_s21 + $0xa8] sm:$0xff] %v419_v46  ;;  %v436_v15 = vmul.f32 %v1304_v1, %v179_v12  ;;  %v437_v19 = vmul.f32 %v1304_v1, %v180_v16  ;;  %v438_v20 = vmul.f32 %v1304_v1, %v181_v17  ;;  %v187_v29 = vld [vmem:[%s1297_s6 + $0x170] sm:$0xff]  ;;  %v188_v30 = vld [vmem:[%s1297_s6 + $0x178] sm:$0xff] }
  0x4e   : > { %676 = vst [vmem:[%s1320_s21 + $0xb0] sm:$0xff] %v420_v47  ;;  %677 = vst [vmem:[%s1320_s21 + $0xb8] sm:$0xff] %v421_v48  ;;  %v439_v21 = vmul.f32 %v1304_v1, %v182_v18  ;;  %v440_v25 = vmul.f32 %v1304_v1, %v183_v22  ;;  %v441_v26 = vmul.f32 %v1304_v1, %v184_v23  ;;  %v189_v34 = vld [vmem:[%s1297_s6 + $0x180] sm:$0xff]  ;;  %v190_v35 = vld [vmem:[%s1297_s6 + $0x188] sm:$0xff] }
  0x4f   : > { %678 = vst [vmem:[%s1320_s21 + $0xc0] sm:$0xff] %v422_v52  ;;  %679 = vst [vmem:[%s1320_s21 + $0xc8] sm:$0xff] %v423_v53  ;;  %v442_v27 = vmul.f32 %v1304_v1, %v185_v24  ;;  %v443_v31 = vmul.f32 %v1304_v1, %v186_v28  ;;  %v444_v32 = vmul.f32 %v1304_v1, %v187_v29  ;;  %v191_v36 = vld [vmem:[%s1297_s6 + $0x190] sm:$0xff]  ;;  %v192_v40 = vld [vmem:[%s1297_s6 + $0x198] sm:$0xff] }
  0x50   : > { %680 = vst [vmem:[%s1320_s21 + $0xd0] sm:$0xff] %v424_v54  ;;  %681 = vst [vmem:[%s1320_s21 + $0xd8] sm:$0xff] %v425_v58  ;;  %v445_v33 = vmul.f32 %v1304_v1, %v188_v30  ;;  %v446_v37 = vmul.f32 %v1304_v1, %v189_v34  ;;  %v447_v38 = vmul.f32 %v1304_v1, %v190_v35  ;;  %v193_v41 = vld [vmem:[%s1297_s6 + $0x1a0] sm:$0xff]  ;;  %v194_v42 = vld [vmem:[%s1297_s6 + $0x1a8] sm:$0xff] }
  0x51   : > { %682 = vst [vmem:[%s1320_s21 + $0xe0] sm:$0xff] %v426_v59  ;;  %683 = vst [vmem:[%s1320_s21 + $0xe8] sm:$0xff] %v427_v60  ;;  %v448_v39 = vmul.f32 %v1304_v1, %v191_v36  ;;  %v449_v43 = vmul.f32 %v1304_v1, %v192_v40  ;;  %v450_v44 = vmul.f32 %v1304_v1, %v193_v41  ;;  %v195_v46 = vld [vmem:[%s1297_s6 + $0x1b0] sm:$0xff]  ;;  %v196_v47 = vld [vmem:[%s1297_s6 + $0x1b8] sm:$0xff] }
  0x52   : > { %684 = vst [vmem:[%s1320_s21 + $0xf0] sm:$0xff] %v428_v0  ;;  %685 = vst [vmem:[%s1320_s21 + $0xf8] sm:$0xff] %v429_v2  ;;  %v451_v45 = vmul.f32 %v1304_v1, %v194_v42  ;;  %v197_v48 = vld [vmem:[%s1297_s6 + $0x1c0] sm:$0xff]  ;;  %v452_v49 = vmul.f32 %v1304_v1, %v195_v46  ;;  %v453_v50 = vmul.f32 %v1304_v1, %v196_v47  ;;  %v198_v52 = vld [vmem:[%s1297_s6 + $0x1c8] sm:$0xff] }
  0x53   : > { %686 = vst [vmem:[%s1320_s21 + $0x100] sm:$0xff] %v430_v3  ;;  %687 = vst [vmem:[%s1320_s21 + $0x108] sm:$0xff] %v431_v7  ;;  %v454_v51 = vmul.f32 %v1304_v1, %v197_v48  ;;  %v199_v53 = vld [vmem:[%s1297_s6 + $0x1d0] sm:$0xff]  ;;  %v200_v54 = vld [vmem:[%s1297_s6 + $0x1d8] sm:$0xff]  ;;  %v455_v55 = vmul.f32 %v1304_v1, %v198_v52 }
  0x54   : > { %688 = vst [vmem:[%s1320_s21 + $0x110] sm:$0xff] %v432_v8  ;;  %689 = vst [vmem:[%s1320_s21 + $0x118] sm:$0xff] %v433_v9  ;;  %v456_v56 = vmul.f32 %v1304_v1, %v199_v53  ;;  %v457_v57 = vmul.f32 %v1304_v1, %v200_v54  ;;  %v201_v58 = vld [vmem:[%s1297_s6 + $0x1e0] sm:$0xff]  ;;  %v202_v59 = vld [vmem:[%s1297_s6 + $0x1e8] sm:$0xff] }
  0x55   : > { %690 = vst [vmem:[%s1320_s21 + $0x120] sm:$0xff] %v434_v13  ;;  %691 = vst [vmem:[%s1320_s21 + $0x128] sm:$0xff] %v435_v14  ;;  %v203_v60 = vld [vmem:[%s1297_s6 + $0x1f0] sm:$0xff]  ;;  %v458_v61 = vmul.f32 %v1304_v1, %v201_v58  ;;  %v459_v62 = vmul.f32 %v1304_v1, %v202_v59  ;;  %v204_v0 = vld [vmem:[%s1297_s6 + $0x1f8] sm:$0xff] }
  0x56   : > { %692 = vst [vmem:[%s1320_s21 + $0x130] sm:$0xff] %v436_v15  ;;  %693 = vst [vmem:[%s1320_s21 + $0x138] sm:$0xff] %v437_v19  ;;  %v460_v63 = vmul.f32 %v1304_v1, %v203_v60  ;;  %v205_v2 = vld [vmem:[%s1297_s6 + $0x200] sm:$0xff]  ;;  %v206_v3 = vld [vmem:[%s1297_s6 + $0x208] sm:$0xff]  ;;  %v461_v4 = vmul.f32 %v1304_v1, %v204_v0 }
  0x57   : > { %694 = vst [vmem:[%s1320_s21 + $0x140] sm:$0xff] %v438_v20  ;;  %695 = vst [vmem:[%s1320_s21 + $0x148] sm:$0xff] %v439_v21  ;;  %v462_v5 = vmul.f32 %v1304_v1, %v205_v2  ;;  %v463_v6 = vmul.f32 %v1304_v1, %v206_v3  ;;  %v207_v7 = vld [vmem:[%s1297_s6 + $0x210] sm:$0xff]  ;;  %v208_v8 = vld [vmem:[%s1297_s6 + $0x218] sm:$0xff] }
  0x58   : > { %696 = vst [vmem:[%s1320_s21 + $0x150] sm:$0xff] %v440_v25  ;;  %697 = vst [vmem:[%s1320_s21 + $0x158] sm:$0xff] %v441_v26  ;;  %v209_v9 = vld [vmem:[%s1297_s6 + $0x220] sm:$0xff]  ;;  %v464_v10 = vmul.f32 %v1304_v1, %v207_v7  ;;  %v465_v11 = vmul.f32 %v1304_v1, %v208_v8  ;;  %v210_v13 = vld [vmem:[%s1297_s6 + $0x228] sm:$0xff] }
  0x59   : > { %698 = vst [vmem:[%s1320_s21 + $0x160] sm:$0xff] %v442_v27  ;;  %699 = vst [vmem:[%s1320_s21 + $0x168] sm:$0xff] %v443_v31  ;;  %v466_v12 = vmul.f32 %v1304_v1, %v209_v9  ;;  %v211_v14 = vld [vmem:[%s1297_s6 + $0x230] sm:$0xff]  ;;  %v212_v15 = vld [vmem:[%s1297_s6 + $0x238] sm:$0xff]  ;;  %v467_v16 = vmul.f32 %v1304_v1, %v210_v13 }
  0x5a   : > { %700 = vst [vmem:[%s1320_s21 + $0x170] sm:$0xff] %v444_v32  ;;  %701 = vst [vmem:[%s1320_s21 + $0x178] sm:$0xff] %v445_v33  ;;  %v468_v17 = vmul.f32 %v1304_v1, %v211_v14  ;;  %v469_v18 = vmul.f32 %v1304_v1, %v212_v15  ;;  %v213_v19 = vld [vmem:[%s1297_s6 + $0x240] sm:$0xff]  ;;  %v214_v20 = vld [vmem:[%s1297_s6 + $0x248] sm:$0xff] }
  0x5b   : > { %702 = vst [vmem:[%s1320_s21 + $0x180] sm:$0xff] %v446_v37  ;;  %703 = vst [vmem:[%s1320_s21 + $0x188] sm:$0xff] %v447_v38  ;;  %v215_v21 = vld [vmem:[%s1297_s6 + $0x250] sm:$0xff]  ;;  %v470_v22 = vmul.f32 %v1304_v1, %v213_v19  ;;  %v471_v23 = vmul.f32 %v1304_v1, %v214_v20  ;;  %v216_v25 = vld [vmem:[%s1297_s6 + $0x258] sm:$0xff] }
  0x5c   : > { %704 = vst [vmem:[%s1320_s21 + $0x190] sm:$0xff] %v448_v39  ;;  %705 = vst [vmem:[%s1320_s21 + $0x198] sm:$0xff] %v449_v43  ;;  %v472_v24 = vmul.f32 %v1304_v1, %v215_v21  ;;  %v217_v26 = vld [vmem:[%s1297_s6 + $0x260] sm:$0xff]  ;;  %v218_v27 = vld [vmem:[%s1297_s6 + $0x268] sm:$0xff]  ;;  %v473_v28 = vmul.f32 %v1304_v1, %v216_v25 }
  0x5d   : > { %706 = vst [vmem:[%s1320_s21 + $0x1a0] sm:$0xff] %v450_v44  ;;  %707 = vst [vmem:[%s1320_s21 + $0x1a8] sm:$0xff] %v451_v45  ;;  %v474_v29 = vmul.f32 %v1304_v1, %v217_v26  ;;  %v475_v30 = vmul.f32 %v1304_v1, %v218_v27  ;;  %v219_v31 = vld [vmem:[%s1297_s6 + $0x270] sm:$0xff]  ;;  %v220_v32 = vld [vmem:[%s1297_s6 + $0x278] sm:$0xff] }
  0x5e   : > { %708 = vst [vmem:[%s1320_s21 + $0x1b0] sm:$0xff] %v452_v49  ;;  %709 = vst [vmem:[%s1320_s21 + $0x1b8] sm:$0xff] %v453_v50  ;;  %v221_v33 = vld [vmem:[%s1297_s6 + $0x280] sm:$0xff]  ;;  %v476_v34 = vmul.f32 %v1304_v1, %v219_v31  ;;  %v477_v35 = vmul.f32 %v1304_v1, %v220_v32  ;;  %v222_v37 = vld [vmem:[%s1297_s6 + $0x288] sm:$0xff] }
  0x5f   : > { %710 = vst [vmem:[%s1320_s21 + $0x1c0] sm:$0xff] %v454_v51  ;;  %711 = vst [vmem:[%s1320_s21 + $0x1c8] sm:$0xff] %v455_v55  ;;  %v478_v36 = vmul.f32 %v1304_v1, %v221_v33  ;;  %v223_v38 = vld [vmem:[%s1297_s6 + $0x290] sm:$0xff]  ;;  %v224_v39 = vld [vmem:[%s1297_s6 + $0x298] sm:$0xff]  ;;  %v479_v40 = vmul.f32 %v1304_v1, %v222_v37 }
  0x60   : > { %712 = vst [vmem:[%s1320_s21 + $0x1d0] sm:$0xff] %v456_v56  ;;  %713 = vst [vmem:[%s1320_s21 + $0x1d8] sm:$0xff] %v457_v57  ;;  %v480_v41 = vmul.f32 %v1304_v1, %v223_v38  ;;  %v481_v42 = vmul.f32 %v1304_v1, %v224_v39  ;;  %v225_v43 = vld [vmem:[%s1297_s6 + $0x2a0] sm:$0xff]  ;;  %v226_v44 = vld [vmem:[%s1297_s6 + $0x2a8] sm:$0xff] }
  0x61   : > { %714 = vst [vmem:[%s1320_s21 + $0x1e0] sm:$0xff] %v458_v61  ;;  %715 = vst [vmem:[%s1320_s21 + $0x1e8] sm:$0xff] %v459_v62  ;;  %v227_v45 = vld [vmem:[%s1297_s6 + $0x2b0] sm:$0xff]  ;;  %v482_v46 = vmul.f32 %v1304_v1, %v225_v43  ;;  %v483_v47 = vmul.f32 %v1304_v1, %v226_v44  ;;  %v228_v49 = vld [vmem:[%s1297_s6 + $0x2b8] sm:$0xff] }
  0x62   : > { %716 = vst [vmem:[%s1320_s21 + $0x1f0] sm:$0xff] %v460_v63  ;;  %717 = vst [vmem:[%s1320_s21 + $0x1f8] sm:$0xff] %v461_v4  ;;  %v484_v48 = vmul.f32 %v1304_v1, %v227_v45  ;;  %v229_v50 = vld [vmem:[%s1297_s6 + $0x2c0] sm:$0xff]  ;;  %v230_v51 = vld [vmem:[%s1297_s6 + $0x2c8] sm:$0xff]  ;;  %v485_v52 = vmul.f32 %v1304_v1, %v228_v49 }
  0x63   : > { %718 = vst [vmem:[%s1320_s21 + $0x200] sm:$0xff] %v462_v5  ;;  %719 = vst [vmem:[%s1320_s21 + $0x208] sm:$0xff] %v463_v6  ;;  %v486_v53 = vmul.f32 %v1304_v1, %v229_v50  ;;  %v487_v54 = vmul.f32 %v1304_v1, %v230_v51  ;;  %v231_v55 = vld [vmem:[%s1297_s6 + $0x2d0] sm:$0xff]  ;;  %v232_v56 = vld [vmem:[%s1297_s6 + $0x2d8] sm:$0xff] }
  0x64   : > { %720 = vst [vmem:[%s1320_s21 + $0x210] sm:$0xff] %v464_v10  ;;  %721 = vst [vmem:[%s1320_s21 + $0x218] sm:$0xff] %v465_v11  ;;  %v233_v57 = vld [vmem:[%s1297_s6 + $0x2e0] sm:$0xff]  ;;  %v488_v58 = vmul.f32 %v1304_v1, %v231_v55  ;;  %v489_v59 = vmul.f32 %v1304_v1, %v232_v56  ;;  %v234_v61 = vld [vmem:[%s1297_s6 + $0x2e8] sm:$0xff] }
  0x65   : > { %722 = vst [vmem:[%s1320_s21 + $0x220] sm:$0xff] %v466_v12  ;;  %723 = vst [vmem:[%s1320_s21 + $0x228] sm:$0xff] %v467_v16  ;;  %v490_v60 = vmul.f32 %v1304_v1, %v233_v57  ;;  %v235_v62 = vld [vmem:[%s1297_s6 + $0x2f0] sm:$0xff]  ;;  %v236_v63 = vld [vmem:[%s1297_s6 + $0x2f8] sm:$0xff]  ;;  %v491_v0 = vmul.f32 %v1304_v1, %v234_v61 }
  0x66   : > { %724 = vst [vmem:[%s1320_s21 + $0x230] sm:$0xff] %v468_v17  ;;  %725 = vst [vmem:[%s1320_s21 + $0x238] sm:$0xff] %v469_v18  ;;  %v492_v2 = vmul.f32 %v1304_v1, %v235_v62  ;;  %v493_v3 = vmul.f32 %v1304_v1, %v236_v63  ;;  %v237_v4 = vld [vmem:[%s1297_s6 + $0x300] sm:$0xff]  ;;  %v238_v5 = vld [vmem:[%s1297_s6 + $0x308] sm:$0xff] }
  0x67   : > { %726 = vst [vmem:[%s1320_s21 + $0x240] sm:$0xff] %v470_v22  ;;  %727 = vst [vmem:[%s1320_s21 + $0x248] sm:$0xff] %v471_v23  ;;  %v239_v6 = vld [vmem:[%s1297_s6 + $0x310] sm:$0xff]  ;;  %v494_v7 = vmul.f32 %v1304_v1, %v237_v4  ;;  %v495_v8 = vmul.f32 %v1304_v1, %v238_v5  ;;  %v240_v10 = vld [vmem:[%s1297_s6 + $0x318] sm:$0xff] }
  0x68   : > { %728 = vst [vmem:[%s1320_s21 + $0x250] sm:$0xff] %v472_v24  ;;  %729 = vst [vmem:[%s1320_s21 + $0x258] sm:$0xff] %v473_v28  ;;  %v496_v9 = vmul.f32 %v1304_v1, %v239_v6  ;;  %v241_v11 = vld [vmem:[%s1297_s6 + $0x320] sm:$0xff]  ;;  %v242_v12 = vld [vmem:[%s1297_s6 + $0x328] sm:$0xff]  ;;  %v497_v13 = vmul.f32 %v1304_v1, %v240_v10 }
  0x69   : > { %730 = vst [vmem:[%s1320_s21 + $0x260] sm:$0xff] %v474_v29  ;;  %731 = vst [vmem:[%s1320_s21 + $0x268] sm:$0xff] %v475_v30  ;;  %v498_v14 = vmul.f32 %v1304_v1, %v241_v11  ;;  %v499_v15 = vmul.f32 %v1304_v1, %v242_v12  ;;  %v243_v16 = vld [vmem:[%s1297_s6 + $0x330] sm:$0xff]  ;;  %v244_v17 = vld [vmem:[%s1297_s6 + $0x338] sm:$0xff] }
  0x6a   : > { %732 = vst [vmem:[%s1320_s21 + $0x270] sm:$0xff] %v476_v34  ;;  %733 = vst [vmem:[%s1320_s21 + $0x278] sm:$0xff] %v477_v35  ;;  %v245_v18 = vld [vmem:[%s1297_s6 + $0x340] sm:$0xff]  ;;  %v500_v19 = vmul.f32 %v1304_v1, %v243_v16  ;;  %v501_v20 = vmul.f32 %v1304_v1, %v244_v17  ;;  %v246_v22 = vld [vmem:[%s1297_s6 + $0x348] sm:$0xff] }
  0x6b   : > { %734 = vst [vmem:[%s1320_s21 + $0x280] sm:$0xff] %v478_v36  ;;  %735 = vst [vmem:[%s1320_s21 + $0x288] sm:$0xff] %v479_v40  ;;  %v502_v21 = vmul.f32 %v1304_v1, %v245_v18  ;;  %v247_v23 = vld [vmem:[%s1297_s6 + $0x350] sm:$0xff]  ;;  %v248_v24 = vld [vmem:[%s1297_s6 + $0x358] sm:$0xff]  ;;  %v503_v25 = vmul.f32 %v1304_v1, %v246_v22 }
  0x6c   : > { %736 = vst [vmem:[%s1320_s21 + $0x290] sm:$0xff] %v480_v41  ;;  %737 = vst [vmem:[%s1320_s21 + $0x298] sm:$0xff] %v481_v42  ;;  %v504_v26 = vmul.f32 %v1304_v1, %v247_v23  ;;  %v505_v27 = vmul.f32 %v1304_v1, %v248_v24  ;;  %v249_v28 = vld [vmem:[%s1297_s6 + $0x360] sm:$0xff]  ;;  %v250_v29 = vld [vmem:[%s1297_s6 + $0x368] sm:$0xff] }
  0x6d   : > { %738 = vst [vmem:[%s1320_s21 + $0x2a0] sm:$0xff] %v482_v46  ;;  %739 = vst [vmem:[%s1320_s21 + $0x2a8] sm:$0xff] %v483_v47  ;;  %v251_v30 = vld [vmem:[%s1297_s6 + $0x370] sm:$0xff]  ;;  %v506_v31 = vmul.f32 %v1304_v1, %v249_v28  ;;  %v507_v32 = vmul.f32 %v1304_v1, %v250_v29  ;;  %v252_v34 = vld [vmem:[%s1297_s6 + $0x378] sm:$0xff] }
  0x6e   : > { %740 = vst [vmem:[%s1320_s21 + $0x2b0] sm:$0xff] %v484_v48  ;;  %741 = vst [vmem:[%s1320_s21 + $0x2b8] sm:$0xff] %v485_v52  ;;  %v508_v33 = vmul.f32 %v1304_v1, %v251_v30  ;;  %v253_v35 = vld [vmem:[%s1297_s6 + $0x380] sm:$0xff]  ;;  %v254_v36 = vld [vmem:[%s1297_s6 + $0x388] sm:$0xff]  ;;  %v509_v37 = vmul.f32 %v1304_v1, %v252_v34 }
  0x6f   : > { %742 = vst [vmem:[%s1320_s21 + $0x2c0] sm:$0xff] %v486_v53  ;;  %743 = vst [vmem:[%s1320_s21 + $0x2c8] sm:$0xff] %v487_v54  ;;  %v510_v38 = vmul.f32 %v1304_v1, %v253_v35  ;;  %v511_v39 = vmul.f32 %v1304_v1, %v254_v36  ;;  %v255_v40 = vld [vmem:[%s1297_s6 + $0x390] sm:$0xff]  ;;  %v256_v41 = vld [vmem:[%s1297_s6 + $0x398] sm:$0xff] }
  0x70   : > { %744 = vst [vmem:[%s1320_s21 + $0x2d0] sm:$0xff] %v488_v58  ;;  %745 = vst [vmem:[%s1320_s21 + $0x2d8] sm:$0xff] %v489_v59  ;;  %v257_v42 = vld [vmem:[%s1297_s6 + $0x3a0] sm:$0xff]  ;;  %v512_v43 = vmul.f32 %v1304_v1, %v255_v40  ;;  %v513_v44 = vmul.f32 %v1304_v1, %v256_v41  ;;  %v258_v46 = vld [vmem:[%s1297_s6 + $0x3a8] sm:$0xff] }
  0x71   : > { %746 = vst [vmem:[%s1320_s21 + $0x2e0] sm:$0xff] %v490_v60  ;;  %747 = vst [vmem:[%s1320_s21 + $0x2e8] sm:$0xff] %v491_v0  ;;  %v514_v45 = vmul.f32 %v1304_v1, %v257_v42  ;;  %v259_v47 = vld [vmem:[%s1297_s6 + $0x3b0] sm:$0xff]  ;;  %v260_v48 = vld [vmem:[%s1297_s6 + $0x3b8] sm:$0xff]  ;;  %v515_v49 = vmul.f32 %v1304_v1, %v258_v46 }
  0x72   : > { %748 = vst [vmem:[%s1320_s21 + $0x2f0] sm:$0xff] %v492_v2  ;;  %749 = vst [vmem:[%s1320_s21 + $0x2f8] sm:$0xff] %v493_v3  ;;  %v516_v50 = vmul.f32 %v1304_v1, %v259_v47  ;;  %v517_v51 = vmul.f32 %v1304_v1, %v260_v48  ;;  %v261_v52 = vld [vmem:[%s1297_s6 + $0x3c0] sm:$0xff]  ;;  %v262_v53 = vld [vmem:[%s1297_s6 + $0x3c8] sm:$0xff] }
  0x73   : > { %750 = vst [vmem:[%s1320_s21 + $0x300] sm:$0xff] %v494_v7  ;;  %751 = vst [vmem:[%s1320_s21 + $0x308] sm:$0xff] %v495_v8  ;;  %v263_v54 = vld [vmem:[%s1297_s6 + $0x3d0] sm:$0xff]  ;;  %v518_v55 = vmul.f32 %v1304_v1, %v261_v52  ;;  %v519_v56 = vmul.f32 %v1304_v1, %v262_v53  ;;  %v264_v58 = vld [vmem:[%s1297_s6 + $0x3d8] sm:$0xff] }
  0x74   : > { %752 = vst [vmem:[%s1320_s21 + $0x310] sm:$0xff] %v496_v9  ;;  %753 = vst [vmem:[%s1320_s21 + $0x318] sm:$0xff] %v497_v13  ;;  %v520_v57 = vmul.f32 %v1304_v1, %v263_v54  ;;  %v265_v59 = vld [vmem:[%s1297_s6 + $0x3e0] sm:$0xff]  ;;  %v266_v60 = vld [vmem:[%s1297_s6 + $0x3e8] sm:$0xff]  ;;  %v521_v61 = vmul.f32 %v1304_v1, %v264_v58 }
  0x75   : > { %754 = vst [vmem:[%s1320_s21 + $0x320] sm:$0xff] %v498_v14  ;;  %755 = vst [vmem:[%s1320_s21 + $0x328] sm:$0xff] %v499_v15  ;;  %v522_v62 = vmul.f32 %v1304_v1, %v265_v59  ;;  %v523_v63 = vmul.f32 %v1304_v1, %v266_v60  ;;  %v267_v0 = vld [vmem:[%s1297_s6 + $0x3f0] sm:$0xff]  ;;  %v268_v2 = vld [vmem:[%s1297_s6 + $0x3f8] sm:$0xff] }
  0x76   : > { %756 = vst [vmem:[%s1320_s21 + $0x330] sm:$0xff] %v500_v19  ;;  %757 = vst [vmem:[%s1320_s21 + $0x338] sm:$0xff] %v501_v20  ;;  %v269_v3 = vld [vmem:[%s1297_s6 + $0x400] sm:$0xff]  ;;  %v524_v4 = vmul.f32 %v1304_v1, %v267_v0  ;;  %v525_v5 = vmul.f32 %v1304_v1, %v268_v2  ;;  %v270_v7 = vld [vmem:[%s1297_s6 + $0x408] sm:$0xff] }
  0x77   : > { %758 = vst [vmem:[%s1320_s21 + $0x340] sm:$0xff] %v502_v21  ;;  %759 = vst [vmem:[%s1320_s21 + $0x348] sm:$0xff] %v503_v25  ;;  %v526_v6 = vmul.f32 %v1304_v1, %v269_v3  ;;  %v271_v8 = vld [vmem:[%s1297_s6 + $0x410] sm:$0xff]  ;;  %v272_v9 = vld [vmem:[%s1297_s6 + $0x418] sm:$0xff]  ;;  %v527_v10 = vmul.f32 %v1304_v1, %v270_v7 }
  0x78   : > { %760 = vst [vmem:[%s1320_s21 + $0x350] sm:$0xff] %v504_v26  ;;  %761 = vst [vmem:[%s1320_s21 + $0x358] sm:$0xff] %v505_v27  ;;  %v528_v11 = vmul.f32 %v1304_v1, %v271_v8  ;;  %v529_v12 = vmul.f32 %v1304_v1, %v272_v9  ;;  %v273_v13 = vld [vmem:[%s1297_s6 + $0x420] sm:$0xff]  ;;  %v274_v14 = vld [vmem:[%s1297_s6 + $0x428] sm:$0xff] }
  0x79   : > { %762 = vst [vmem:[%s1320_s21 + $0x360] sm:$0xff] %v506_v31  ;;  %763 = vst [vmem:[%s1320_s21 + $0x368] sm:$0xff] %v507_v32  ;;  %v275_v15 = vld [vmem:[%s1297_s6 + $0x430] sm:$0xff]  ;;  %v530_v16 = vmul.f32 %v1304_v1, %v273_v13  ;;  %v531_v17 = vmul.f32 %v1304_v1, %v274_v14  ;;  %v276_v19 = vld [vmem:[%s1297_s6 + $0x438] sm:$0xff] }
  0x7a   : > { %764 = vst [vmem:[%s1320_s21 + $0x370] sm:$0xff] %v508_v33  ;;  %765 = vst [vmem:[%s1320_s21 + $0x378] sm:$0xff] %v509_v37  ;;  %v532_v18 = vmul.f32 %v1304_v1, %v275_v15  ;;  %v277_v20 = vld [vmem:[%s1297_s6 + $0x440] sm:$0xff]  ;;  %v278_v21 = vld [vmem:[%s1297_s6 + $0x448] sm:$0xff]  ;;  %v533_v22 = vmul.f32 %v1304_v1, %v276_v19 }
  0x7b   : > { %766 = vst [vmem:[%s1320_s21 + $0x380] sm:$0xff] %v510_v38  ;;  %767 = vst [vmem:[%s1320_s21 + $0x388] sm:$0xff] %v511_v39  ;;  %v534_v23 = vmul.f32 %v1304_v1, %v277_v20  ;;  %v535_v24 = vmul.f32 %v1304_v1, %v278_v21  ;;  %v279_v25 = vld [vmem:[%s1297_s6 + $0x450] sm:$0xff]  ;;  %v280_v26 = vld [vmem:[%s1297_s6 + $0x458] sm:$0xff] }
  0x7c   : > { %768 = vst [vmem:[%s1320_s21 + $0x390] sm:$0xff] %v512_v43  ;;  %769 = vst [vmem:[%s1320_s21 + $0x398] sm:$0xff] %v513_v44  ;;  %v281_v27 = vld [vmem:[%s1297_s6 + $0x460] sm:$0xff]  ;;  %v536_v28 = vmul.f32 %v1304_v1, %v279_v25  ;;  %v537_v29 = vmul.f32 %v1304_v1, %v280_v26  ;;  %v282_v31 = vld [vmem:[%s1297_s6 + $0x468] sm:$0xff] }
  0x7d   : > { %770 = vst [vmem:[%s1320_s21 + $0x3a0] sm:$0xff] %v514_v45  ;;  %771 = vst [vmem:[%s1320_s21 + $0x3a8] sm:$0xff] %v515_v49  ;;  %v538_v30 = vmul.f32 %v1304_v1, %v281_v27  ;;  %v283_v32 = vld [vmem:[%s1297_s6 + $0x470] sm:$0xff]  ;;  %v284_v33 = vld [vmem:[%s1297_s6 + $0x478] sm:$0xff]  ;;  %v539_v34 = vmul.f32 %v1304_v1, %v282_v31 }
  0x7e   : > { %772 = vst [vmem:[%s1320_s21 + $0x3b0] sm:$0xff] %v516_v50  ;;  %773 = vst [vmem:[%s1320_s21 + $0x3b8] sm:$0xff] %v517_v51  ;;  %v540_v35 = vmul.f32 %v1304_v1, %v283_v32  ;;  %v541_v36 = vmul.f32 %v1304_v1, %v284_v33  ;;  %v285_v37 = vld [vmem:[%s1297_s6 + $0x480] sm:$0xff]  ;;  %v286_v38 = vld [vmem:[%s1297_s6 + $0x488] sm:$0xff] }
  0x7f   : > { %774 = vst [vmem:[%s1320_s21 + $0x3c0] sm:$0xff] %v518_v55  ;;  %775 = vst [vmem:[%s1320_s21 + $0x3c8] sm:$0xff] %v519_v56  ;;  %v287_v39 = vld [vmem:[%s1297_s6 + $0x490] sm:$0xff]  ;;  %v542_v40 = vmul.f32 %v1304_v1, %v285_v37  ;;  %v543_v41 = vmul.f32 %v1304_v1, %v286_v38  ;;  %v288_v43 = vld [vmem:[%s1297_s6 + $0x498] sm:$0xff] }
  0x80   : > { %776 = vst [vmem:[%s1320_s21 + $0x3d0] sm:$0xff] %v520_v57  ;;  %777 = vst [vmem:[%s1320_s21 + $0x3d8] sm:$0xff] %v521_v61  ;;  %v544_v42 = vmul.f32 %v1304_v1, %v287_v39  ;;  %v289_v44 = vld [vmem:[%s1297_s6 + $0x4a0] sm:$0xff]  ;;  %v290_v45 = vld [vmem:[%s1297_s6 + $0x4a8] sm:$0xff]  ;;  %v545_v46 = vmul.f32 %v1304_v1, %v288_v43 }
  0x81   : > { %778 = vst [vmem:[%s1320_s21 + $0x3e0] sm:$0xff] %v522_v62  ;;  %779 = vst [vmem:[%s1320_s21 + $0x3e8] sm:$0xff] %v523_v63  ;;  %v546_v47 = vmul.f32 %v1304_v1, %v289_v44  ;;  %v547_v48 = vmul.f32 %v1304_v1, %v290_v45  ;;  %v291_v49 = vld [vmem:[%s1297_s6 + $0x4b0] sm:$0xff]  ;;  %v292_v50 = vld [vmem:[%s1297_s6 + $0x4b8] sm:$0xff] }
  0x82   : > { %780 = vst [vmem:[%s1320_s21 + $0x3f0] sm:$0xff] %v524_v4  ;;  %781 = vst [vmem:[%s1320_s21 + $0x3f8] sm:$0xff] %v525_v5  ;;  %v293_v51 = vld [vmem:[%s1297_s6 + $0x4c0] sm:$0xff]  ;;  %v548_v52 = vmul.f32 %v1304_v1, %v291_v49  ;;  %v549_v53 = vmul.f32 %v1304_v1, %v292_v50  ;;  %v294_v55 = vld [vmem:[%s1297_s6 + $0x4c8] sm:$0xff] }
  0x83   : > { %782 = vst [vmem:[%s1320_s21 + $0x400] sm:$0xff] %v526_v6  ;;  %783 = vst [vmem:[%s1320_s21 + $0x408] sm:$0xff] %v527_v10  ;;  %v550_v54 = vmul.f32 %v1304_v1, %v293_v51  ;;  %v295_v56 = vld [vmem:[%s1297_s6 + $0x4d0] sm:$0xff]  ;;  %v296_v57 = vld [vmem:[%s1297_s6 + $0x4d8] sm:$0xff]  ;;  %v551_v58 = vmul.f32 %v1304_v1, %v294_v55 }
  0x84   : > { %784 = vst [vmem:[%s1320_s21 + $0x410] sm:$0xff] %v528_v11  ;;  %785 = vst [vmem:[%s1320_s21 + $0x418] sm:$0xff] %v529_v12  ;;  %v552_v59 = vmul.f32 %v1304_v1, %v295_v56  ;;  %v553_v60 = vmul.f32 %v1304_v1, %v296_v57  ;;  %v297_v61 = vld [vmem:[%s1297_s6 + $0x4e0] sm:$0xff]  ;;  %v298_v62 = vld [vmem:[%s1297_s6 + $0x4e8] sm:$0xff] }
  0x85   : > { %786 = vst [vmem:[%s1320_s21 + $0x420] sm:$0xff] %v530_v16  ;;  %787 = vst [vmem:[%s1320_s21 + $0x428] sm:$0xff] %v531_v17  ;;  %v299_v63 = vld [vmem:[%s1297_s6 + $0x4f0] sm:$0xff]  ;;  %v554_v0 = vmul.f32 %v1304_v1, %v297_v61  ;;  %v555_v2 = vmul.f32 %v1304_v1, %v298_v62  ;;  %v300_v4 = vld [vmem:[%s1297_s6 + $0x4f8] sm:$0xff] }
  0x86   : > { %788 = vst [vmem:[%s1320_s21 + $0x430] sm:$0xff] %v532_v18  ;;  %789 = vst [vmem:[%s1320_s21 + $0x438] sm:$0xff] %v533_v22  ;;  %v556_v3 = vmul.f32 %v1304_v1, %v299_v63  ;;  %v301_v5 = vld [vmem:[%s1297_s6 + $0x500] sm:$0xff]  ;;  %v302_v6 = vld [vmem:[%s1297_s6 + $0x508] sm:$0xff]  ;;  %v557_v7 = vmul.f32 %v1304_v1, %v300_v4 }
  0x87   : > { %790 = vst [vmem:[%s1320_s21 + $0x440] sm:$0xff] %v534_v23  ;;  %791 = vst [vmem:[%s1320_s21 + $0x448] sm:$0xff] %v535_v24  ;;  %v558_v8 = vmul.f32 %v1304_v1, %v301_v5  ;;  %v559_v9 = vmul.f32 %v1304_v1, %v302_v6  ;;  %v303_v10 = vld [vmem:[%s1297_s6 + $0x510] sm:$0xff]  ;;  %v304_v11 = vld [vmem:[%s1297_s6 + $0x518] sm:$0xff] }
  0x88   : > { %792 = vst [vmem:[%s1320_s21 + $0x450] sm:$0xff] %v536_v28  ;;  %793 = vst [vmem:[%s1320_s21 + $0x458] sm:$0xff] %v537_v29  ;;  %v305_v12 = vld [vmem:[%s1297_s6 + $0x520] sm:$0xff]  ;;  %v560_v13 = vmul.f32 %v1304_v1, %v303_v10  ;;  %v561_v14 = vmul.f32 %v1304_v1, %v304_v11  ;;  %v306_v16 = vld [vmem:[%s1297_s6 + $0x528] sm:$0xff] }
  0x89   : > { %794 = vst [vmem:[%s1320_s21 + $0x460] sm:$0xff] %v538_v30  ;;  %795 = vst [vmem:[%s1320_s21 + $0x468] sm:$0xff] %v539_v34  ;;  %v562_v15 = vmul.f32 %v1304_v1, %v305_v12  ;;  %v307_v17 = vld [vmem:[%s1297_s6 + $0x530] sm:$0xff]  ;;  %v308_v18 = vld [vmem:[%s1297_s6 + $0x538] sm:$0xff]  ;;  %v563_v19 = vmul.f32 %v1304_v1, %v306_v16 }
  0x8a   : > { %796 = vst [vmem:[%s1320_s21 + $0x470] sm:$0xff] %v540_v35  ;;  %797 = vst [vmem:[%s1320_s21 + $0x478] sm:$0xff] %v541_v36  ;;  %v564_v20 = vmul.f32 %v1304_v1, %v307_v17  ;;  %v565_v21 = vmul.f32 %v1304_v1, %v308_v18  ;;  %v309_v22 = vld [vmem:[%s1297_s6 + $0x540] sm:$0xff]  ;;  %v310_v23 = vld [vmem:[%s1297_s6 + $0x548] sm:$0xff] }
  0x8b   : > { %798 = vst [vmem:[%s1320_s21 + $0x480] sm:$0xff] %v542_v40  ;;  %799 = vst [vmem:[%s1320_s21 + $0x488] sm:$0xff] %v543_v41  ;;  %v311_v24 = vld [vmem:[%s1297_s6 + $0x550] sm:$0xff]  ;;  %v566_v25 = vmul.f32 %v1304_v1, %v309_v22  ;;  %v567_v26 = vmul.f32 %v1304_v1, %v310_v23  ;;  %v312_v28 = vld [vmem:[%s1297_s6 + $0x558] sm:$0xff] }
  0x8c   : > { %800 = vst [vmem:[%s1320_s21 + $0x490] sm:$0xff] %v544_v42  ;;  %801 = vst [vmem:[%s1320_s21 + $0x498] sm:$0xff] %v545_v46  ;;  %v568_v27 = vmul.f32 %v1304_v1, %v311_v24  ;;  %v313_v29 = vld [vmem:[%s1297_s6 + $0x560] sm:$0xff]  ;;  %v314_v30 = vld [vmem:[%s1297_s6 + $0x568] sm:$0xff]  ;;  %v569_v31 = vmul.f32 %v1304_v1, %v312_v28 }
  0x8d   : > { %802 = vst [vmem:[%s1320_s21 + $0x4a0] sm:$0xff] %v546_v47  ;;  %803 = vst [vmem:[%s1320_s21 + $0x4a8] sm:$0xff] %v547_v48  ;;  %v570_v32 = vmul.f32 %v1304_v1, %v313_v29  ;;  %v571_v33 = vmul.f32 %v1304_v1, %v314_v30  ;;  %v315_v34 = vld [vmem:[%s1297_s6 + $0x570] sm:$0xff]  ;;  %v316_v35 = vld [vmem:[%s1297_s6 + $0x578] sm:$0xff] }
  0x8e   : > { %804 = vst [vmem:[%s1320_s21 + $0x4b0] sm:$0xff] %v548_v52  ;;  %805 = vst [vmem:[%s1320_s21 + $0x4b8] sm:$0xff] %v549_v53  ;;  %v317_v36 = vld [vmem:[%s1297_s6 + $0x580] sm:$0xff]  ;;  %v572_v37 = vmul.f32 %v1304_v1, %v315_v34  ;;  %v573_v38 = vmul.f32 %v1304_v1, %v316_v35  ;;  %v318_v40 = vld [vmem:[%s1297_s6 + $0x588] sm:$0xff] }
  0x8f   : > { %806 = vst [vmem:[%s1320_s21 + $0x4c0] sm:$0xff] %v550_v54  ;;  %807 = vst [vmem:[%s1320_s21 + $0x4c8] sm:$0xff] %v551_v58  ;;  %v574_v39 = vmul.f32 %v1304_v1, %v317_v36  ;;  %v319_v41 = vld [vmem:[%s1297_s6 + $0x590] sm:$0xff]  ;;  %v320_v42 = vld [vmem:[%s1297_s6 + $0x598] sm:$0xff]  ;;  %v575_v43 = vmul.f32 %v1304_v1, %v318_v40 }
  0x90   : > { %808 = vst [vmem:[%s1320_s21 + $0x4d0] sm:$0xff] %v552_v59  ;;  %809 = vst [vmem:[%s1320_s21 + $0x4d8] sm:$0xff] %v553_v60  ;;  %v576_v44 = vmul.f32 %v1304_v1, %v319_v41  ;;  %v577_v45 = vmul.f32 %v1304_v1, %v320_v42  ;;  %v321_v46 = vld [vmem:[%s1297_s6 + $0x5a0] sm:$0xff]  ;;  %v322_v47 = vld [vmem:[%s1297_s6 + $0x5a8] sm:$0xff] }
  0x91   : > { %810 = vst [vmem:[%s1320_s21 + $0x4e0] sm:$0xff] %v554_v0  ;;  %811 = vst [vmem:[%s1320_s21 + $0x4e8] sm:$0xff] %v555_v2  ;;  %v323_v48 = vld [vmem:[%s1297_s6 + $0x5b0] sm:$0xff]  ;;  %v578_v49 = vmul.f32 %v1304_v1, %v321_v46  ;;  %v579_v50 = vmul.f32 %v1304_v1, %v322_v47  ;;  %v324_v52 = vld [vmem:[%s1297_s6 + $0x5b8] sm:$0xff] }
  0x92   : > { %812 = vst [vmem:[%s1320_s21 + $0x4f0] sm:$0xff] %v556_v3  ;;  %813 = vst [vmem:[%s1320_s21 + $0x4f8] sm:$0xff] %v557_v7  ;;  %v580_v51 = vmul.f32 %v1304_v1, %v323_v48  ;;  %v325_v53 = vld [vmem:[%s1297_s6 + $0x5c0] sm:$0xff]  ;;  %v326_v54 = vld [vmem:[%s1297_s6 + $0x5c8] sm:$0xff]  ;;  %v581_v55 = vmul.f32 %v1304_v1, %v324_v52 }
  0x93   : > { %814 = vst [vmem:[%s1320_s21 + $0x500] sm:$0xff] %v558_v8  ;;  %815 = vst [vmem:[%s1320_s21 + $0x508] sm:$0xff] %v559_v9  ;;  %v582_v56 = vmul.f32 %v1304_v1, %v325_v53  ;;  %v583_v57 = vmul.f32 %v1304_v1, %v326_v54  ;;  %v327_v58 = vld [vmem:[%s1297_s6 + $0x5d0] sm:$0xff]  ;;  %v328_v59 = vld [vmem:[%s1297_s6 + $0x5d8] sm:$0xff] }
  0x94   : > { %816 = vst [vmem:[%s1320_s21 + $0x510] sm:$0xff] %v560_v13  ;;  %817 = vst [vmem:[%s1320_s21 + $0x518] sm:$0xff] %v561_v14  ;;  %v329_v60 = vld [vmem:[%s1297_s6 + $0x5e0] sm:$0xff]  ;;  %v584_v61 = vmul.f32 %v1304_v1, %v327_v58  ;;  %v585_v62 = vmul.f32 %v1304_v1, %v328_v59  ;;  %v330_v0 = vld [vmem:[%s1297_s6 + $0x5e8] sm:$0xff] }
  0x95   : > { %818 = vst [vmem:[%s1320_s21 + $0x520] sm:$0xff] %v562_v15  ;;  %819 = vst [vmem:[%s1320_s21 + $0x528] sm:$0xff] %v563_v19  ;;  %v586_v63 = vmul.f32 %v1304_v1, %v329_v60  ;;  %v331_v2 = vld [vmem:[%s1297_s6 + $0x5f0] sm:$0xff]  ;;  %v332_v3 = vld [vmem:[%s1297_s6 + $0x5f8] sm:$0xff]  ;;  %v587_v4 = vmul.f32 %v1304_v1, %v330_v0 }
  0x96   : > { %820 = vst [vmem:[%s1320_s21 + $0x530] sm:$0xff] %v564_v20  ;;  %821 = vst [vmem:[%s1320_s21 + $0x538] sm:$0xff] %v565_v21  ;;  %v588_v5 = vmul.f32 %v1304_v1, %v331_v2  ;;  %v589_v6 = vmul.f32 %v1304_v1, %v332_v3  ;;  %v333_v7 = vld [vmem:[%s1297_s6 + $0x600] sm:$0xff]  ;;  %v334_v8 = vld [vmem:[%s1297_s6 + $0x608] sm:$0xff] }
  0x97   : > { %822 = vst [vmem:[%s1320_s21 + $0x540] sm:$0xff] %v566_v25  ;;  %823 = vst [vmem:[%s1320_s21 + $0x548] sm:$0xff] %v567_v26  ;;  %v335_v9 = vld [vmem:[%s1297_s6 + $0x610] sm:$0xff]  ;;  %v590_v10 = vmul.f32 %v1304_v1, %v333_v7  ;;  %v591_v11 = vmul.f32 %v1304_v1, %v334_v8  ;;  %v336_v13 = vld [vmem:[%s1297_s6 + $0x618] sm:$0xff] }
  0x98   : > { %824 = vst [vmem:[%s1320_s21 + $0x550] sm:$0xff] %v568_v27  ;;  %825 = vst [vmem:[%s1320_s21 + $0x558] sm:$0xff] %v569_v31  ;;  %v592_v12 = vmul.f32 %v1304_v1, %v335_v9  ;;  %v337_v14 = vld [vmem:[%s1297_s6 + $0x620] sm:$0xff]  ;;  %v338_v15 = vld [vmem:[%s1297_s6 + $0x628] sm:$0xff]  ;;  %v593_v16 = vmul.f32 %v1304_v1, %v336_v13 }
  0x99   : > { %826 = vst [vmem:[%s1320_s21 + $0x560] sm:$0xff] %v570_v32  ;;  %827 = vst [vmem:[%s1320_s21 + $0x568] sm:$0xff] %v571_v33  ;;  %v594_v17 = vmul.f32 %v1304_v1, %v337_v14  ;;  %v595_v18 = vmul.f32 %v1304_v1, %v338_v15  ;;  %v339_v19 = vld [vmem:[%s1297_s6 + $0x630] sm:$0xff]  ;;  %v340_v20 = vld [vmem:[%s1297_s6 + $0x638] sm:$0xff] }
  0x9a   : > { %828 = vst [vmem:[%s1320_s21 + $0x570] sm:$0xff] %v572_v37  ;;  %829 = vst [vmem:[%s1320_s21 + $0x578] sm:$0xff] %v573_v38  ;;  %v341_v21 = vld [vmem:[%s1297_s6 + $0x640] sm:$0xff]  ;;  %v596_v22 = vmul.f32 %v1304_v1, %v339_v19  ;;  %v597_v23 = vmul.f32 %v1304_v1, %v340_v20  ;;  %v342_v25 = vld [vmem:[%s1297_s6 + $0x648] sm:$0xff] }
  0x9b   : > { %830 = vst [vmem:[%s1320_s21 + $0x580] sm:$0xff] %v574_v39  ;;  %831 = vst [vmem:[%s1320_s21 + $0x588] sm:$0xff] %v575_v43  ;;  %v598_v24 = vmul.f32 %v1304_v1, %v341_v21  ;;  %v343_v26 = vld [vmem:[%s1297_s6 + $0x650] sm:$0xff]  ;;  %v344_v27 = vld [vmem:[%s1297_s6 + $0x658] sm:$0xff]  ;;  %v599_v28 = vmul.f32 %v1304_v1, %v342_v25 }
  0x9c   : > { %832 = vst [vmem:[%s1320_s21 + $0x590] sm:$0xff] %v576_v44  ;;  %833 = vst [vmem:[%s1320_s21 + $0x598] sm:$0xff] %v577_v45  ;;  %v600_v29 = vmul.f32 %v1304_v1, %v343_v26  ;;  %v601_v30 = vmul.f32 %v1304_v1, %v344_v27  ;;  %v345_v31 = vld [vmem:[%s1297_s6 + $0x660] sm:$0xff]  ;;  %v346_v32 = vld [vmem:[%s1297_s6 + $0x668] sm:$0xff] }
  0x9d   : > { %834 = vst [vmem:[%s1320_s21 + $0x5a0] sm:$0xff] %v578_v49  ;;  %835 = vst [vmem:[%s1320_s21 + $0x5a8] sm:$0xff] %v579_v50  ;;  %v347_v33 = vld [vmem:[%s1297_s6 + $0x670] sm:$0xff]  ;;  %v602_v34 = vmul.f32 %v1304_v1, %v345_v31  ;;  %v603_v35 = vmul.f32 %v1304_v1, %v346_v32  ;;  %v348_v37 = vld [vmem:[%s1297_s6 + $0x678] sm:$0xff] }
  0x9e   : > { %836 = vst [vmem:[%s1320_s21 + $0x5b0] sm:$0xff] %v580_v51  ;;  %837 = vst [vmem:[%s1320_s21 + $0x5b8] sm:$0xff] %v581_v55  ;;  %v604_v36 = vmul.f32 %v1304_v1, %v347_v33  ;;  %v349_v38 = vld [vmem:[%s1297_s6 + $0x680] sm:$0xff]  ;;  %v350_v39 = vld [vmem:[%s1297_s6 + $0x688] sm:$0xff]  ;;  %v605_v40 = vmul.f32 %v1304_v1, %v348_v37 }
  0x9f   : > { %838 = vst [vmem:[%s1320_s21 + $0x5c0] sm:$0xff] %v582_v56  ;;  %839 = vst [vmem:[%s1320_s21 + $0x5c8] sm:$0xff] %v583_v57  ;;  %v606_v41 = vmul.f32 %v1304_v1, %v349_v38  ;;  %v607_v42 = vmul.f32 %v1304_v1, %v350_v39  ;;  %v351_v43 = vld [vmem:[%s1297_s6 + $0x690] sm:$0xff]  ;;  %v352_v44 = vld [vmem:[%s1297_s6 + $0x698] sm:$0xff] }
  0xa0   : > { %840 = vst [vmem:[%s1320_s21 + $0x5d0] sm:$0xff] %v584_v61  ;;  %841 = vst [vmem:[%s1320_s21 + $0x5d8] sm:$0xff] %v585_v62  ;;  %v353_v45 = vld [vmem:[%s1297_s6 + $0x6a0] sm:$0xff]  ;;  %v608_v46 = vmul.f32 %v1304_v1, %v351_v43  ;;  %v609_v47 = vmul.f32 %v1304_v1, %v352_v44  ;;  %v354_v49 = vld [vmem:[%s1297_s6 + $0x6a8] sm:$0xff] }
  0xa1   : > { %842 = vst [vmem:[%s1320_s21 + $0x5e0] sm:$0xff] %v586_v63  ;;  %843 = vst [vmem:[%s1320_s21 + $0x5e8] sm:$0xff] %v587_v4  ;;  %v610_v48 = vmul.f32 %v1304_v1, %v353_v45  ;;  %v355_v50 = vld [vmem:[%s1297_s6 + $0x6b0] sm:$0xff]  ;;  %v356_v51 = vld [vmem:[%s1297_s6 + $0x6b8] sm:$0xff]  ;;  %v611_v52 = vmul.f32 %v1304_v1, %v354_v49 }
  0xa2   : > { %844 = vst [vmem:[%s1320_s21 + $0x5f0] sm:$0xff] %v588_v5  ;;  %845 = vst [vmem:[%s1320_s21 + $0x5f8] sm:$0xff] %v589_v6  ;;  %v612_v53 = vmul.f32 %v1304_v1, %v355_v50  ;;  %v613_v54 = vmul.f32 %v1304_v1, %v356_v51  ;;  %v357_v55 = vld [vmem:[%s1297_s6 + $0x6c0] sm:$0xff]  ;;  %v358_v56 = vld [vmem:[%s1297_s6 + $0x6c8] sm:$0xff] }
  0xa3   : > { %846 = vst [vmem:[%s1320_s21 + $0x600] sm:$0xff] %v590_v10  ;;  %847 = vst [vmem:[%s1320_s21 + $0x608] sm:$0xff] %v591_v11  ;;  %v359_v57 = vld [vmem:[%s1297_s6 + $0x6d0] sm:$0xff]  ;;  %v614_v58 = vmul.f32 %v1304_v1, %v357_v55  ;;  %v615_v59 = vmul.f32 %v1304_v1, %v358_v56  ;;  %v360_v61 = vld [vmem:[%s1297_s6 + $0x6d8] sm:$0xff] }
  0xa4   : > { %848 = vst [vmem:[%s1320_s21 + $0x610] sm:$0xff] %v592_v12  ;;  %849 = vst [vmem:[%s1320_s21 + $0x618] sm:$0xff] %v593_v16  ;;  %v616_v60 = vmul.f32 %v1304_v1, %v359_v57  ;;  %v361_v62 = vld [vmem:[%s1297_s6 + $0x6e0] sm:$0xff]  ;;  %v362_v63 = vld [vmem:[%s1297_s6 + $0x6e8] sm:$0xff]  ;;  %v617_v0 = vmul.f32 %v1304_v1, %v360_v61 }
  0xa5   : > { %850 = vst [vmem:[%s1320_s21 + $0x620] sm:$0xff] %v594_v17  ;;  %851 = vst [vmem:[%s1320_s21 + $0x628] sm:$0xff] %v595_v18  ;;  %v618_v2 = vmul.f32 %v1304_v1, %v361_v62  ;;  %v619_v3 = vmul.f32 %v1304_v1, %v362_v63  ;;  %v363_v4 = vld [vmem:[%s1297_s6 + $0x6f0] sm:$0xff]  ;;  %v364_v5 = vld [vmem:[%s1297_s6 + $0x6f8] sm:$0xff] }
  0xa6   : > { %852 = vst [vmem:[%s1320_s21 + $0x630] sm:$0xff] %v596_v22  ;;  %853 = vst [vmem:[%s1320_s21 + $0x638] sm:$0xff] %v597_v23  ;;  %v365_v6 = vld [vmem:[%s1297_s6 + $0x700] sm:$0xff]  ;;  %v620_v7 = vmul.f32 %v1304_v1, %v363_v4  ;;  %v621_v8 = vmul.f32 %v1304_v1, %v364_v5  ;;  %v366_v10 = vld [vmem:[%s1297_s6 + $0x708] sm:$0xff] }
  0xa7   : > { %854 = vst [vmem:[%s1320_s21 + $0x640] sm:$0xff] %v598_v24  ;;  %855 = vst [vmem:[%s1320_s21 + $0x648] sm:$0xff] %v599_v28  ;;  %v622_v9 = vmul.f32 %v1304_v1, %v365_v6  ;;  %v367_v11 = vld [vmem:[%s1297_s6 + $0x710] sm:$0xff]  ;;  %v368_v12 = vld [vmem:[%s1297_s6 + $0x718] sm:$0xff]  ;;  %v623_v13 = vmul.f32 %v1304_v1, %v366_v10 }
  0xa8   : > { %856 = vst [vmem:[%s1320_s21 + $0x650] sm:$0xff] %v600_v29  ;;  %857 = vst [vmem:[%s1320_s21 + $0x658] sm:$0xff] %v601_v30  ;;  %v624_v14 = vmul.f32 %v1304_v1, %v367_v11  ;;  %v625_v15 = vmul.f32 %v1304_v1, %v368_v12  ;;  %v369_v16 = vld [vmem:[%s1297_s6 + $0x720] sm:$0xff]  ;;  %v370_v17 = vld [vmem:[%s1297_s6 + $0x728] sm:$0xff] }
  0xa9   : > { %858 = vst [vmem:[%s1320_s21 + $0x660] sm:$0xff] %v602_v34  ;;  %859 = vst [vmem:[%s1320_s21 + $0x668] sm:$0xff] %v603_v35  ;;  %v371_v18 = vld [vmem:[%s1297_s6 + $0x730] sm:$0xff]  ;;  %v626_v19 = vmul.f32 %v1304_v1, %v369_v16  ;;  %v627_v20 = vmul.f32 %v1304_v1, %v370_v17  ;;  %v372_v22 = vld [vmem:[%s1297_s6 + $0x738] sm:$0xff] }
  0xaa   : > { %860 = vst [vmem:[%s1320_s21 + $0x670] sm:$0xff] %v604_v36  ;;  %861 = vst [vmem:[%s1320_s21 + $0x678] sm:$0xff] %v605_v40  ;;  %v628_v21 = vmul.f32 %v1304_v1, %v371_v18  ;;  %v373_v23 = vld [vmem:[%s1297_s6 + $0x740] sm:$0xff]  ;;  %v374_v24 = vld [vmem:[%s1297_s6 + $0x748] sm:$0xff]  ;;  %v629_v25 = vmul.f32 %v1304_v1, %v372_v22 }
  0xab   : > { %862 = vst [vmem:[%s1320_s21 + $0x680] sm:$0xff] %v606_v41  ;;  %863 = vst [vmem:[%s1320_s21 + $0x688] sm:$0xff] %v607_v42  ;;  %v630_v26 = vmul.f32 %v1304_v1, %v373_v23  ;;  %v631_v27 = vmul.f32 %v1304_v1, %v374_v24  ;;  %v375_v28 = vld [vmem:[%s1297_s6 + $0x750] sm:$0xff]  ;;  %v376_v29 = vld [vmem:[%s1297_s6 + $0x758] sm:$0xff] }
  0xac   : > { %864 = vst [vmem:[%s1320_s21 + $0x690] sm:$0xff] %v608_v46  ;;  %865 = vst [vmem:[%s1320_s21 + $0x698] sm:$0xff] %v609_v47  ;;  %v377_v30 = vld [vmem:[%s1297_s6 + $0x760] sm:$0xff]  ;;  %v632_v31 = vmul.f32 %v1304_v1, %v375_v28  ;;  %v633_v32 = vmul.f32 %v1304_v1, %v376_v29  ;;  %v378_v34 = vld [vmem:[%s1297_s6 + $0x768] sm:$0xff] }
  0xad   : > { %866 = vst [vmem:[%s1320_s21 + $0x6a0] sm:$0xff] %v610_v48  ;;  %867 = vst [vmem:[%s1320_s21 + $0x6a8] sm:$0xff] %v611_v52  ;;  %v634_v33 = vmul.f32 %v1304_v1, %v377_v30  ;;  %v379_v35 = vld [vmem:[%s1297_s6 + $0x770] sm:$0xff]  ;;  %v380_v36 = vld [vmem:[%s1297_s6 + $0x778] sm:$0xff]  ;;  %v635_v37 = vmul.f32 %v1304_v1, %v378_v34 }
  0xae   : > { %868 = vst [vmem:[%s1320_s21 + $0x6b0] sm:$0xff] %v612_v53  ;;  %869 = vst [vmem:[%s1320_s21 + $0x6b8] sm:$0xff] %v613_v54  ;;  %v636_v38 = vmul.f32 %v1304_v1, %v379_v35  ;;  %v637_v39 = vmul.f32 %v1304_v1, %v380_v36  ;;  %v381_v40 = vld [vmem:[%s1297_s6 + $0x780] sm:$0xff]  ;;  %v382_v41 = vld [vmem:[%s1297_s6 + $0x788] sm:$0xff] }
  0xaf   : > { %870 = vst [vmem:[%s1320_s21 + $0x6c0] sm:$0xff] %v614_v58  ;;  %871 = vst [vmem:[%s1320_s21 + $0x6c8] sm:$0xff] %v615_v59  ;;  %v383_v42 = vld [vmem:[%s1297_s6 + $0x790] sm:$0xff]  ;;  %v638_v43 = vmul.f32 %v1304_v1, %v381_v40  ;;  %v639_v44 = vmul.f32 %v1304_v1, %v382_v41  ;;  %v384_v46 = vld [vmem:[%s1297_s6 + $0x798] sm:$0xff] }
  0xb0   : > { %872 = vst [vmem:[%s1320_s21 + $0x6d0] sm:$0xff] %v616_v60  ;;  %873 = vst [vmem:[%s1320_s21 + $0x6d8] sm:$0xff] %v617_v0  ;;  %v640_v45 = vmul.f32 %v1304_v1, %v383_v42  ;;  %v385_v47 = vld [vmem:[%s1297_s6 + $0x7a0] sm:$0xff]  ;;  %v386_v48 = vld [vmem:[%s1297_s6 + $0x7a8] sm:$0xff]  ;;  %v641_v49 = vmul.f32 %v1304_v1, %v384_v46 }
  0xb1   : > { %874 = vst [vmem:[%s1320_s21 + $0x6e0] sm:$0xff] %v618_v2  ;;  %875 = vst [vmem:[%s1320_s21 + $0x6e8] sm:$0xff] %v619_v3  ;;  %v642_v50 = vmul.f32 %v1304_v1, %v385_v47  ;;  %v643_v51 = vmul.f32 %v1304_v1, %v386_v48  ;;  %v387_v52 = vld [vmem:[%s1297_s6 + $0x7b0] sm:$0xff]  ;;  %v388_v53 = vld [vmem:[%s1297_s6 + $0x7b8] sm:$0xff] }
  0xb2   : > { %876 = vst [vmem:[%s1320_s21 + $0x6f0] sm:$0xff] %v620_v7  ;;  %877 = vst [vmem:[%s1320_s21 + $0x6f8] sm:$0xff] %v621_v8  ;;  %v389_v54 = vld [vmem:[%s1297_s6 + $0x7c0] sm:$0xff]  ;;  %v644_v55 = vmul.f32 %v1304_v1, %v387_v52  ;;  %v645_v56 = vmul.f32 %v1304_v1, %v388_v53  ;;  %v390_v58 = vld [vmem:[%s1297_s6 + $0x7c8] sm:$0xff] }
  0xb3   : > { %878 = vst [vmem:[%s1320_s21 + $0x700] sm:$0xff] %v622_v9  ;;  %879 = vst [vmem:[%s1320_s21 + $0x708] sm:$0xff] %v623_v13  ;;  %v646_v57 = vmul.f32 %v1304_v1, %v389_v54  ;;  %v391_v59 = vld [vmem:[%s1297_s6 + $0x7d0] sm:$0xff]  ;;  %v392_v60 = vld [vmem:[%s1297_s6 + $0x7d8] sm:$0xff]  ;;  %v647_v61 = vmul.f32 %v1304_v1, %v390_v58 }
  0xb4   : > { %880 = vst [vmem:[%s1320_s21 + $0x710] sm:$0xff] %v624_v14  ;;  %881 = vst [vmem:[%s1320_s21 + $0x718] sm:$0xff] %v625_v15  ;;  %v648_v62 = vmul.f32 %v1304_v1, %v391_v59  ;;  %v649_v63 = vmul.f32 %v1304_v1, %v392_v60  ;;  %v393_v0 = vld [vmem:[%s1297_s6 + $0x7e0] sm:$0xff]  ;;  %v394_v2 = vld [vmem:[%s1297_s6 + $0x7e8] sm:$0xff] }
  0xb5   : > { %882 = vst [vmem:[%s1320_s21 + $0x720] sm:$0xff] %v626_v19  ;;  %883 = vst [vmem:[%s1320_s21 + $0x728] sm:$0xff] %v627_v20  ;;  %v395_v3 = vld [vmem:[%s1297_s6 + $0x7f0] sm:$0xff]  ;;  %v650_v4 = vmul.f32 %v1304_v1, %v393_v0  ;;  %v651_v5 = vmul.f32 %v1304_v1, %v394_v2  ;;  %v396_v7 = vld [vmem:[%s1297_s6 + $0x7f8] sm:$0xff] }
  0xb6   : > { %884 = vst [vmem:[%s1320_s21 + $0x730] sm:$0xff] %v628_v21  ;;  %885 = vst [vmem:[%s1320_s21 + $0x738] sm:$0xff] %v629_v25  ;;  %v652_v6 = vmul.f32 %v1304_v1, %v395_v3  ;;  %v653_v8 = vmul.f32 %v1304_v1, %v396_v7 }
  0xb7   : > { %886 = vst [vmem:[%s1320_s21 + $0x740] sm:$0xff] %v630_v26  ;;  %887 = vst [vmem:[%s1320_s21 + $0x748] sm:$0xff] %v631_v27 }
  0xb8   : > { %888 = vst [vmem:[%s1320_s21 + $0x750] sm:$0xff] %v632_v31  ;;  %889 = vst [vmem:[%s1320_s21 + $0x758] sm:$0xff] %v633_v32 }
  0xb9   : > { %890 = vst [vmem:[%s1320_s21 + $0x760] sm:$0xff] %v634_v33  ;;  %891 = vst [vmem:[%s1320_s21 + $0x768] sm:$0xff] %v635_v37 }
  0xba   : > { %892 = vst [vmem:[%s1320_s21 + $0x770] sm:$0xff] %v636_v38  ;;  %893 = vst [vmem:[%s1320_s21 + $0x778] sm:$0xff] %v637_v39 }
  0xbb   : > { %894 = vst [vmem:[%s1320_s21 + $0x780] sm:$0xff] %v638_v43  ;;  %895 = vst [vmem:[%s1320_s21 + $0x788] sm:$0xff] %v639_v44 }
  0xbc   : > { %896 = vst [vmem:[%s1320_s21 + $0x790] sm:$0xff] %v640_v45  ;;  %897 = vst [vmem:[%s1320_s21 + $0x798] sm:$0xff] %v641_v49 }
  0xbd   : > { %898 = vst [vmem:[%s1320_s21 + $0x7a0] sm:$0xff] %v642_v50  ;;  %899 = vst [vmem:[%s1320_s21 + $0x7a8] sm:$0xff] %v643_v51 }
  0xbe   : > { %900 = vst [vmem:[%s1320_s21 + $0x7b0] sm:$0xff] %v644_v55  ;;  %901 = vst [vmem:[%s1320_s21 + $0x7b8] sm:$0xff] %v645_v56 }
  0xbf   : > { %902 = vst [vmem:[%s1320_s21 + $0x7c0] sm:$0xff] %v646_v57  ;;  %903 = vst [vmem:[%s1320_s21 + $0x7c8] sm:$0xff] %v647_v61 }
  0xc0   : > { %904 = vst [vmem:[%s1320_s21 + $0x7d0] sm:$0xff] %v648_v62  ;;  %905 = vst [vmem:[%s1320_s21 + $0x7d8] sm:$0xff] %v649_v63 }
  0xc1   : > { %906 = vst [vmem:[%s1320_s21 + $0x7e0] sm:$0xff] %v650_v4  ;;  %907 = vst [vmem:[%s1320_s21 + $0x7e8] sm:$0xff] %v651_v5 }
  0xc2   : > { %908 = vst [vmem:[%s1320_s21 + $0x7f0] sm:$0xff] %v652_v6  ;;  %909 = vst [vmem:[%s1320_s21 + $0x7f8] sm:$0xff] %v653_v8 }
  0xc3   : > { %1111 = shalt.err (!%p1108_p1)
}
  0xc4   : > { %s1112_s18 = scalar_lea.hbm %s2072_s7, 32768  ;;  %s1116_s25 = scalar_lea.hbm %s2127_s2, 131072 }
  0xc5   : > { %p1113_p3 = scmp.ne.s32.totalorder %s2072_s7, %s1112_s18  ;;  %p1117_p0 = scmp.lt.u32.totalorder %s2072_s7, %s2127_s2 }
  0xc6   : > { %p1118_p2 = scmp.lt.u32.totalorder %s1116_s25, %s1112_s18  ;;  %p1120_p6 = scmp.lt.u32.totalorder %s1112_s18, %s2072_s7 }
  0xc7   : > { %p1114_p4 = pnand %p1113_p3, %p2134_p10 }
  0xc8   : > { %p1119_p7 = por %p1118_p2, %p1117_p0 }
  0xc9   : > { %p1115_p5 = pneg %p1114_p4 }
  0xca   : > { %p1121_p11 = por %p1120_p6, %p1119_p7 }
  0xcc   : > { %p1122_p12 = pnand %p1121_p11, %p1115_p5 }
  0xce   : > { %1125 = shalt.err (!%p1122_p12)
}
  0xcf   : > { %s1170_s30 = smov 2048   ;;  %s1171_s6 = smov 128  }
  0xd0   : > { %1020 = dma.vmem_to_hbm [thread:$0]  (%p2134_p10), %s2074_s4, 32768, %s2072_s7, %s911_s8, %s1170_s30, %s1170_s30, %s1171_s6  }
  0xd1 PF: > { %p1031_p8 = scmp.ge.s32.totalorder %s1164_s14, 2  ;;  %s940_s29 = sand.u32 1, %s1152_s11  }
  0xd2   : > { %p2135_p9 = scmp.ne.s32.totalorder %s2132_s23, 0  ;;  %s941_s21 = scalar_lea.sflag [#allocation6], %s940_s29 }
  0xd4   : > { %p1027_p13 = pnand %p1031_p8, %p2135_p9 }
  0xd6   : > { %1147 = dma.done.wait (!%p1027_p13), %s941_s21, 32768  }
  0xd7   : > { %1149 = vsyncadd (!%p1027_p13), %s941_s21, 4294934528  ;;  %p16_p1 = scmp.ge.s32.totalorder %s1215_s16, 6   ;;  %s2136_s11 = smov %s1156_s12 }
  0xd8   : > { %s2137_s12 = smov %s1160_s13  ;;  %s2138_s13 = smov %s1227_s19 }
  0xd9   : > { %s2139_s14 = smov %s1215_s16  ;;  %18 = sbr.rel (!%p16_p1) target bundleno = 7 (0x7), region = 69 }
  0xe0   :  { %946 = vsyncpa [#allocation5], 1 }
  0xe1   :  { %948 = vsyncpa [#allocation5 + $0x1], 1 }
  0xe2   :  { %949 = vsyncpa [#allocation6], 1 }
  0xe3   :  { %951 = vsyncpa [#allocation6 + $0x1], 1 }

</bundles_post_ra>
